<compile_context>
chip_gen: v7x
topology: tpu7x:2x2x1
jax: 0.10.0
libtpu: 0.0.40
codegen_flags: <defaults>
</compile_context>

<pallas_src>
import jax
import jax.numpy as jnp
from jax.experimental import pallas as pl
from jax.experimental.pallas import tpu as pltpu

TAU = 0.8


def contrast_kernel(tgt_ref, samp_ref, w1_ref, b1_ref, w2_ref, b2_ref, loss_ref):
    """One grid step == T targets and their (pos, neg) sample sets.

    tgt_ref : (T, H)      target embeddings for this block
    samp_ref: (T, S, H)   samples; slot 0 along S is the positive sample
    w1/w2   : (H, H)      Linear weights, already transposed to (in, out)
    b1/b2   : (1, H)      Linear biases (f32)
    loss_ref: (1, T)      per-target loss for this block (lane-dense)
    """
    T, H = tgt_ref.shape
    S = samp_ref.shape[1]
    inv_tau = 1.0 / TAU

    # ---- Batched mapping: one Linear->ELU->Linear over ((S+1)*T, H) ---------
    # Leading-dim merge of (T,S,H) -> (T*S,H) is layout-free; concat along the
    # leading (untiled) axis keeps both matmuls as a single MXU pass per weight.
    x = jnp.concatenate([tgt_ref[...], samp_ref[...].reshape(T * S, H)], axis=0)

    h = jnp.dot(x, w1_ref[...], preferred_element_type=jnp.float32) + b1_ref[...]
    # ELU(alpha=1); min() guards the unselected exp branch against overflow.
    h = jnp.where(h > 0.0, h, jnp.exp(jnp.minimum(h, 0.0)) - 1.0)
    z = jnp.dot(h.astype(w2_ref.dtype), w2_ref[...],
                preferred_element_type=jnp.float32) + b2_ref[...]

    z1 = z[:T, :]                       # (T, H)     mapped targets
    z2 = z[T:, :].reshape(T, S, H)      # (T, S, H)  mapped samples

    # ---- Cosine-similarity logits, dense (T, S) tail -------------------------
    inv1 = jax.lax.rsqrt(jnp.sum(z1 * z1, axis=-1, keepdims=True))       # (T, 1)
    inv2 = jax.lax.rsqrt(jnp.sum(z2 * z2, axis=-1))                      # (T, S)
    num = jnp.sum(z1[:, None, :] * z2, axis=-1)                          # (T, S)
    # |logit| <= 1/tau = 1.25 (cosine sim is bounded) -> exp needs no max-shift.
    logits = num * inv1 * inv2 * inv_tau                                 # (T, S)

    denom = jnp.sum(jnp.exp(logits), axis=-1)                            # (T,)
    pos = logits[:, 0]                                                   # (T,)
    # -log( exp(pos) / (sum + 1e-8) ) == log(sum + 1e-8) - pos   (matches ref)
    loss = jnp.log(denom + 1e-8) - pos                                   # (T,)
    loss_ref[...] = loss.reshape(1, T)                                   # lane-dense row


def _round_up(x, m):
    return ((x + m - 1) // m) * m


def contrast_relation(target_emb, samples_emb, w1_t, b1, w2_t, b2, *,
                      block_t=512, matmul_dtype=jnp.float32):
    """target_emb: (N, H), samples_emb: (N, S, H) (sample 0 = positive),
    w*_t: (H, H) pre-transposed to (in, out), b*: (H,). Returns shape (1,).

    matmul_dtype=jnp.bfloat16 gives ~2x MXU rate / half the HBM bytes on
    v6e/v7x (elementwise math stays f32); keep f32 when bit-level agreement
    with the PyTorch module is required.
    """
    N, H = target_emb.shape
    S = samples_emb.shape[1]

    if N == 0:
        return jnp.zeros((1,), jnp.float32)

    # ---- Block-size policy ----------------------------------------------------
    block_t = max(8, (block_t // 8) * 8)
    if N <= block_t:
        T = N                                   # single block (full-dim -> always valid)
        if N >= 256:
            # v7x has 2 TensorCores: split a single large block in two so the
            # "parallel" grid axis can be sharded across cores.
            T = _round_up((N + 1) // 2, 128)
    else:
        T = block_t
    grid = (N + T - 1) // T                     # ragged last block handled by Pallas

    # Per-step VMEM (double-buffered samples + batched activations) stays well
    # under the 16/32 MiB scoped defaults for these block sizes; raise
    # vmem_limit_bytes in CompilerParams before pushing T past ~2048.
    tgt = target_emb.astype(matmul_dtype)
    samp = samples_emb.astype(matmul_dtype)     # native (N, S, H) layout — no transpose
    w1 = w1_t.astype(matmul_dtype)
    w2 = w2_t.astype(matmul_dtype)
    b1r = b1.reshape(1, H).astype(jnp.float32)
    b2r = b2.reshape(1, H).astype(jnp.float32)

    losses = pl.pallas_call(
        contrast_kernel,
        out_shape=jax.ShapeDtypeStruct((grid, T), jnp.float32),
        grid_spec=pltpu.PrefetchScalarGridSpec(
            num_scalar_prefetch=0,
            grid=(grid,),
            in_specs=[
                pl.BlockSpec((T, H), lambda i: (i, 0)),        # targets block i
                pl.BlockSpec((T, S, H), lambda i: (i, 0, 0)),  # samples block i
                pl.BlockSpec((H, H), lambda i: (0, 0)),        # W1^T (resident)
                pl.BlockSpec((1, H), lambda i: (0, 0)),        # b1
                pl.BlockSpec((H, H), lambda i: (0, 0)),        # W2^T (resident)
                pl.BlockSpec((1, H), lambda i: (0, 0)),        # b2
            ],
            out_specs=pl.BlockSpec((1, T), lambda i: (i, 0)),  # lane-dense loss row
        ),
        compiler_params=pltpu.CompilerParams(dimension_semantics=("parallel",)),
    )(tgt, samp, w1, b1r, w2, b2r)

    # Drop padded rows of the ragged last block before the mean.
    mean_loss = jnp.sum(losses.reshape(-1)[:N]) / N
    return mean_loss.reshape(1)  # matches PyTorch output shape [1]


def _reference(target_emb, samples_emb, W1, b1, W2, b2):
    """Pure-JAX mirror of the PyTorch loop, for sanity checking."""
    def mapping_ref(x):
        h = x @ W1.T + b1
        h = jnp.where(h > 0, h, jnp.exp(h) - 1.0)
        return h @ W2.T + b2

    N = target_emb.shape[0]
    losses = []
    for i in range(N):
        z1 = mapping_ref(target_emb[i:i + 1])
        z2 = mapping_ref(samples_emb[i])
        n1 = jnp.linalg.norm(z1, axis=-1, keepdims=True)
        n2 = jnp.linalg.norm(z2, axis=-1, keepdims=True)
        sim = jnp.exp((z1 @ z2.T) / (n1 @ n2.T) / TAU)
        soft = sim / (jnp.sum(sim, axis=1, keepdims=True) + 1e-8)
        losses.append(-jnp.log(soft[0, 0]))
    return jnp.sum(jnp.array(losses)) / N


if __name__ == "__main__":
    key = jax.random.PRNGKey(0)
    N, S, H = 2, 8, 32  # N targets, S = 1 positive + (S-1) negative samples each

    k1, k2, k3, k4, k5, k6 = jax.random.split(key, 6)

    # Deterministic init matching nn.Linear + xavier_normal_(gain=1.414)
    gain = 1.414
    std = gain * (2.0 / (H + H)) ** 0.5
    W1 = std * jax.random.normal(k1, (H, H), jnp.float32)  # (out, in) as in PyTorch
    W2 = std * jax.random.normal(k2, (H, H), jnp.float32)
    bound = 1.0 / (H ** 0.5)
    b1 = jax.random.uniform(k3, (H,), jnp.float32, -bound, bound)
    b2 = jax.random.uniform(k4, (H,), jnp.float32, -bound, bound)

    target_emb = jax.random.normal(k5, (N, H), jnp.float32)
    samples_emb = jax.random.normal(k6, (N, S, H), jnp.float32)

    out = contrast_relation(target_emb, samples_emb, W1.T, b1, W2.T, b2)
    out = jax.block_until_ready(out)
    ref = _reference(target_emb, samples_emb, W1, b1, W2, b2)
    assert jnp.allclose(out[0], ref, rtol=1e-4, atol=1e-5), (out, ref)

    # Second check: multi-block grid with a ragged last block (20 = 2*8 + 4).
    N2 = 20
    k7, k8 = jax.random.split(k6)
    target_emb2 = jax.random.normal(k7, (N2, H), jnp.float32)
    samples_emb2 = jax.random.normal(k8, (N2, S, H), jnp.float32)
    out2 = contrast_relation(target_emb2, samples_emb2, W1.T, b1, W2.T, b2, block_t=8)
    out2 = jax.block_until_ready(out2)
    ref2 = _reference(target_emb2, samples_emb2, W1, b1, W2, b2)
    assert jnp.allclose(out2[0], ref2, rtol=1e-4, atol=1e-5), (out2, ref2)

    print("KERNEL_OK")
</pallas_src>

<mosaic_0001>
module attributes {stable_mosaic.version = 11 : i64} {
  func.func @contrast_kernel(%arg0: i32, %arg1: memref<2x32xf32, #tpu.memory_space<vmem>>, %arg2: memref<2x8x32xf32, #tpu.memory_space<vmem>>, %arg3: memref<32x32xf32, #tpu.memory_space<vmem>>, %arg4: memref<1x32xf32, #tpu.memory_space<vmem>>, %arg5: memref<32x32xf32, #tpu.memory_space<vmem>>, %arg6: memref<1x32xf32, #tpu.memory_space<vmem>>, %arg7: memref<1x2xf32, #tpu.memory_space<vmem>>) attributes {dimension_semantics = [#tpu.dimension_semantics<parallel>], iteration_bounds = array<i64: 1>, scalar_prefetch = 0 : i64, scratch_operands = 0 : i64, tpu.core_type = #tpu.core_type<tc>, window_params = [{transform_indices = @transform_0, window_bounds = array<i64: 2, 32>}, {transform_indices = @transform_1, window_bounds = array<i64: 2, 8, 32>}, {pipeline_mode = #tpu.pipeline_mode<synchronous>, transform_indices = @transform_2, window_bounds = array<i64: 32, 32>}, {pipeline_mode = #tpu.pipeline_mode<synchronous>, transform_indices = @transform_3, window_bounds = array<i64: 1, 32>}, {pipeline_mode = #tpu.pipeline_mode<synchronous>, transform_indices = @transform_4, window_bounds = array<i64: 32, 32>}, {pipeline_mode = #tpu.pipeline_mode<synchronous>, transform_indices = @transform_5, window_bounds = array<i64: 1, 32>}, {transform_indices = @transform_6, window_bounds = array<i64: 1, 2>}]} {
    %c0 = arith.constant 0 : index
    %c0_0 = arith.constant 0 : index
    %0 = vector.load %arg1[%c0, %c0_0] : memref<2x32xf32, #tpu.memory_space<vmem>>, vector<2x32xf32>
    %c0_1 = arith.constant 0 : index
    %c0_2 = arith.constant 0 : index
    %c0_3 = arith.constant 0 : index
    %1 = vector.load %arg2[%c0_1, %c0_2, %c0_3] : memref<2x8x32xf32, #tpu.memory_space<vmem>>, vector<2x8x32xf32>
    %2 = vector.shape_cast %1 : vector<2x8x32xf32> to vector<16x32xf32>
    %3 = tpu.concatenate %0, %2 in 0 : vector<2x32xf32>, vector<16x32xf32> -> vector<18x32xf32>
    %c0_4 = arith.constant 0 : index
    %c0_5 = arith.constant 0 : index
    %4 = vector.load %arg3[%c0_4, %c0_5] : memref<32x32xf32, #tpu.memory_space<vmem>>, vector<32x32xf32>
    %cst = arith.constant dense<0.000000e+00> : vector<18x32xf32>
    %5 = tpu.matmul %3, %4, %cst {dimension_numbers = #tpu.dot_dimension_numbers<[1], [0], [0], [1], [0, 0, 1, 1], [], []>} : vector<18x32xf32>, vector<32x32xf32>, vector<18x32xf32> -> vector<18x32xf32>
    %c0_6 = arith.constant 0 : index
    %c0_7 = arith.constant 0 : index
    %6 = vector.load %arg4[%c0_6, %c0_7] : memref<1x32xf32, #tpu.memory_space<vmem>>, vector<1x32xf32>
    %7 = vector.broadcast %6 : vector<1x32xf32> to vector<18x32xf32>
    %8 = arith.addf %5, %7 : vector<18x32xf32>
    %cst_8 = arith.constant 0.000000e+00 : f32
    %9 = vector.broadcast %cst_8 : f32 to vector<18x32xf32>
    %10 = arith.cmpf ogt, %8, %9 : vector<18x32xf32>
    %cst_9 = arith.constant 0.000000e+00 : f32
    %11 = vector.broadcast %cst_9 : f32 to vector<18x32xf32>
    %12 = arith.minimumf %8, %11 : vector<18x32xf32>
    %13 = math.exp %12 : vector<18x32xf32>
    %cst_10 = arith.constant 1.000000e+00 : f32
    %14 = vector.broadcast %cst_10 : f32 to vector<18x32xf32>
    %15 = arith.subf %13, %14 : vector<18x32xf32>
    %16 = arith.select %10, %8, %15 : vector<18x32xi1>, vector<18x32xf32>
    %c0_11 = arith.constant 0 : index
    %c0_12 = arith.constant 0 : index
    %17 = vector.load %arg5[%c0_11, %c0_12] : memref<32x32xf32, #tpu.memory_space<vmem>>, vector<32x32xf32>
    %cst_13 = arith.constant dense<0.000000e+00> : vector<18x32xf32>
    %18 = tpu.matmul %16, %17, %cst_13 {dimension_numbers = #tpu.dot_dimension_numbers<[1], [0], [0], [1], [0, 0, 1, 1], [], []>} : vector<18x32xf32>, vector<32x32xf32>, vector<18x32xf32> -> vector<18x32xf32>
    %c0_14 = arith.constant 0 : index
    %c0_15 = arith.constant 0 : index
    %19 = vector.load %arg6[%c0_14, %c0_15] : memref<1x32xf32, #tpu.memory_space<vmem>>, vector<1x32xf32>
    %20 = vector.broadcast %19 : vector<1x32xf32> to vector<18x32xf32>
    %21 = arith.addf %18, %20 : vector<18x32xf32>
    %22 = vector.extract_strided_slice %21 {offsets = [0, 0], sizes = [2, 32], strides = [1, 1]} : vector<18x32xf32> to vector<2x32xf32>
    %23 = vector.extract_strided_slice %21 {offsets = [2, 0], sizes = [16, 32], strides = [1, 1]} : vector<18x32xf32> to vector<16x32xf32>
    %24 = vector.shape_cast %23 : vector<16x32xf32> to vector<2x8x32xf32>
    %25 = arith.mulf %22, %22 : vector<2x32xf32>
    %cst_16 = arith.constant dense<0.000000e+00> : vector<2xf32>
    %26 = vector.multi_reduction <add>, %25, %cst_16 [1] : vector<2x32xf32> to vector<2xf32>
    %27 = vector.shape_cast %26 : vector<2xf32> to vector<2x1xf32>
    %28 = math.rsqrt %27 : vector<2x1xf32>
    %29 = arith.mulf %24, %24 : vector<2x8x32xf32>
    %cst_17 = arith.constant dense<0.000000e+00> : vector<2x8xf32>
    %30 = vector.multi_reduction <add>, %29, %cst_17 [2] : vector<2x8x32xf32> to vector<2x8xf32>
    %31 = math.rsqrt %30 : vector<2x8xf32>
    %32 = vector.shape_cast %22 : vector<2x32xf32> to vector<2x1x32xf32>
    %33 = vector.broadcast %32 : vector<2x1x32xf32> to vector<2x8x32xf32>
    %34 = arith.mulf %33, %24 : vector<2x8x32xf32>
    %cst_18 = arith.constant dense<0.000000e+00> : vector<2x8xf32>
    %35 = vector.multi_reduction <add>, %34, %cst_18 [2] : vector<2x8x32xf32> to vector<2x8xf32>
    %36 = vector.broadcast %28 : vector<2x1xf32> to vector<2x8xf32>
    %37 = arith.mulf %35, %36 : vector<2x8xf32>
    %38 = arith.mulf %37, %31 : vector<2x8xf32>
    %cst_19 = arith.constant 1.250000e+00 : f32
    %39 = vector.broadcast %cst_19 : f32 to vector<2x8xf32>
    %40 = arith.mulf %38, %39 : vector<2x8xf32>
    %41 = math.exp %40 : vector<2x8xf32>
    %cst_20 = arith.constant dense<0.000000e+00> : vector<2xf32>
    %42 = vector.multi_reduction <add>, %41, %cst_20 [1] : vector<2x8xf32> to vector<2xf32>
    %43 = vector.extract_strided_slice %40 {offsets = [0, 0], sizes = [2, 1], strides = [1, 1]} : vector<2x8xf32> to vector<2x1xf32>
    %44 = vector.shape_cast %43 : vector<2x1xf32> to vector<2xf32>
    %cst_21 = arith.constant 9.99999993E-9 : f32
    %45 = vector.broadcast %cst_21 : f32 to vector<2xf32>
    %46 = arith.addf %42, %45 : vector<2xf32>
    %47 = math.log %46 : vector<2xf32>
    %48 = arith.subf %47, %44 : vector<2xf32>
    %49 = vector.shape_cast %48 : vector<2xf32> to vector<1x2xf32>
    %c0_22 = arith.constant 0 : index
    %c0_23 = arith.constant 0 : index
    %50 = vector.load %arg7[%c0_22, %c0_23] : memref<1x2xf32, #tpu.memory_space<vmem>>, vector<1x2xf32>
    tpu.vector_store %arg7[%c0_22, %c0_23], %49 {strides = array<i32>} : memref<1x2xf32, #tpu.memory_space<vmem>>, vector<1x2xf32>,
    return
  }
  func.func @transform_0(%arg0: i32) -> (i32, i32) {
    %c0_i32 = arith.constant 0 : i32
    %c0_i32_0 = arith.constant 0 : i32
    return %arg0, %c0_i32 : i32, i32
  }
  func.func @transform_1(%arg0: i32) -> (i32, i32, i32) {
    %c0_i32 = arith.constant 0 : i32
    %c0_i32_0 = arith.constant 0 : i32
    %c0_i32_1 = arith.constant 0 : i32
    return %arg0, %c0_i32, %c0_i32_0 : i32, i32, i32
  }
  func.func @transform_2(%arg0: i32) -> (i32, i32) {
    %c0_i32 = arith.constant 0 : i32
    %c0_i32_0 = arith.constant 0 : i32
    %c0_i32_1 = arith.constant 0 : i32
    return %c0_i32, %c0_i32_0 : i32, i32
  }
  func.func @transform_3(%arg0: i32) -> (i32, i32) {
    %c0_i32 = arith.constant 0 : i32
    %c0_i32_0 = arith.constant 0 : i32
    %c0_i32_1 = arith.constant 0 : i32
    return %c0_i32, %c0_i32_0 : i32, i32
  }
  func.func @transform_4(%arg0: i32) -> (i32, i32) {
    %c0_i32 = arith.constant 0 : i32
    %c0_i32_0 = arith.constant 0 : i32
    %c0_i32_1 = arith.constant 0 : i32
    return %c0_i32, %c0_i32_0 : i32, i32
  }
  func.func @transform_5(%arg0: i32) -> (i32, i32) {
    %c0_i32 = arith.constant 0 : i32
    %c0_i32_0 = arith.constant 0 : i32
    %c0_i32_1 = arith.constant 0 : i32
    return %c0_i32, %c0_i32_0 : i32, i32
  }
  func.func @transform_6(%arg0: i32) -> (i32, i32) {
    %c0_i32 = arith.constant 0 : i32
    %c0_i32_0 = arith.constant 0 : i32
    return %arg0, %c0_i32 : i32, i32
  }
}

</mosaic_0001>

<bundles_post_ra>
// kernel: tpu_custom_call.1
= control target key start
LH: loop header
LB: loop body
LE: loop exit
PB: predicated region body
PF: predicated region fallthrough
CT: control target
= control target key end

     0   :  { %11 = vsyncpa [#allocation3], 0  ;;  %s830_s0 = inlined_call_operand.hbm [shape: f32[2,32], index: 0, kind: input, shape index: {}]   ;;  %s831_s1 = inlined_call_operand.hbm [shape: f32[2,8,32], index: 1, kind: input, shape index: {}]   ;;  %s832_s2 = inlined_call_operand.hbm [shape: f32[32,32], index: 2, kind: input, shape index: {}]   ;;  %s833_s3 = inlined_call_operand.vmem [shape: f32[1,32], index: 3, kind: input, shape index: {}]   ;;  %s834_s4 = inlined_call_operand.hbm [shape: f32[32,32], index: 4, kind: input, shape index: {}]   ;;  %s835_s5 = inlined_call_operand.vmem [shape: f32[1,32], index: 5, kind: input, shape index: {}]   ;;  %s836_s6 = inlined_call_operand.hbm [shape: f32[1,2], index: 6, kind: output, shape index: {}]  }
   0x1   :  { %12 = vsyncpa [#allocation6], 0 }
   0x2   :  { %13 = vsyncpa [#allocation9], 0 }
   0x3   :  { %14 = vsyncpa [#allocation4], 0  ;;  %s676_s21 = smov [#allocation5]   ;;  %s558_s25 = scalar_lea.hbm %s831_s1, 256 }
   0x4   :  { %s30_s22 = sshll.u32 %s676_s21, 4  ;;  %p559_p0 = scmp.ne.s32.totalorder %s831_s1, %s558_s25  ;;  %s31_s22 = int_to_ptr.vmem [resolvable:$true] %s30_s22 }
   0x5   :  { %p562_p1 = scmp.lt.u32.totalorder %s558_s25, %s831_s1 }
   0x7   :  { %p564_p2 = pnand %p562_p1, %p559_p0 }
   0x9   :  { %567 = shalt.err (!%p564_p2)
}
   0xa   :  { %s568_s30 = scalar_lea.vmem %s31_s22, 256  ;;  %p573_p4 = scmp.lt.s32.totalorder %s31_s22, %s31_s22 }
   0xb   :  { %p569_p3 = scmp.ne.s32.totalorder %s31_s22, %s568_s30  ;;  %p574_p5 = scmp.lt.s32.totalorder %s568_s30, %s568_s30 }
   0xd   :  { %p575_p6 = por %p574_p5, %p573_p4 }
   0xf   :  { %p576_p7 = pnand %p575_p6, %p569_p3 }
  0x11   :  { %579 = shalt.err (!%p576_p7)
}
  0x12   :  { %s677_s7 = smov 128   ;;  %s678_s8 = smov 8  }
  0x13   :  { %36 = dma.hbm_to_vmem [thread:$0]  %s831_s1, 256, %s31_s22, [#allocation6], %s677_s7, %s677_s7, %s678_s8  }
  0x14   :  { %s679_s11 = smov [#allocation2]   ;;  %s680_s13 = smov [#allocation7]  }
  0x15   :  { %s21_s12 = sshll.u32 %s679_s11, 4  ;;  %s42_s14 = sshll.u32 %s680_s13, 4  ;;  %s22_s12 = int_to_ptr.vmem [resolvable:$true] %s21_s12  ;;  %s43_s14 = int_to_ptr.vmem [resolvable:$true] %s42_s14 }
  0x16   :  { %s580_s17 = scalar_lea.hbm %s830_s0, 32 }
  0x17   :  { %p581_p8 = scmp.ne.s32.totalorder %s830_s0, %s580_s17  ;;  %p584_p9 = scmp.lt.u32.totalorder %s580_s17, %s830_s0 }
  0x19   :  { %p586_p10 = pnand %p584_p9, %p581_p8 }
  0x1b   :  { %589 = shalt.err (!%p586_p10)
}
  0x1c   :  { %s590_s1 = scalar_lea.vmem %s22_s12, 32  ;;  %p595_p12 = scmp.lt.s32.totalorder %s22_s12, %s22_s12 }
  0x1d   :  { %p591_p11 = scmp.ne.s32.totalorder %s22_s12, %s590_s1  ;;  %p596_p13 = scmp.lt.s32.totalorder %s590_s1, %s590_s1 }
  0x1f   :  { %p597_p0 = por %p596_p13, %p595_p12 }
  0x21   :  { %p598_p1 = pnand %p597_p0, %p591_p11 }
  0x23   :  { %601 = shalt.err (!%p598_p1)
}
  0x24   :  { %24 = dma.hbm_to_vmem [thread:$0]  %s830_s0, 32, %s22_s12, [#allocation3]  }
  0x25   :  { %s602_s26 = scalar_lea.hbm %s832_s2, 512 }
  0x26   :  { %p603_p2 = scmp.ne.s32.totalorder %s832_s2, %s602_s26  ;;  %p606_p3 = scmp.lt.u32.totalorder %s602_s26, %s832_s2 }
  0x28   :  { %p608_p4 = pnand %p606_p3, %p603_p2 }
  0x2a   :  { %611 = shalt.err (!%p608_p4)
}
  0x2b   :  { %s612_s9 = scalar_lea.vmem %s43_s14, 512  ;;  %p617_p6 = scmp.lt.s32.totalorder %s43_s14, %s43_s14 }
  0x2c   :  { %p613_p5 = scmp.ne.s32.totalorder %s43_s14, %s612_s9  ;;  %p618_p7 = scmp.lt.s32.totalorder %s612_s9, %s612_s9 }
  0x2e   :  { %p619_p8 = por %p618_p7, %p617_p6 }
  0x30   :  { %p620_p9 = pnand %p619_p8, %p613_p5 }
  0x32   :  { %623 = shalt.err (!%p620_p9)
}
  0x33   :  { %48 = dma.hbm_to_vmem [thread:$0]  %s832_s2, 512, %s43_s14, [#allocation6], %s677_s7, %s677_s7, %s678_s8  }
  0x34   :  { %s681_s11 = smov [#allocation8]   ;;  %s624_s16 = scalar_lea.hbm %s834_s4, 512 }
  0x35   :  { %s56_s12 = sshll.u32 %s681_s11, 4  ;;  %p625_p10 = scmp.ne.s32.totalorder %s834_s4, %s624_s16  ;;  %s57_s12 = int_to_ptr.vmem [resolvable:$true] %s56_s12 }
  0x36   :  { %p628_p11 = scmp.lt.u32.totalorder %s624_s16, %s834_s4 }
  0x38   :  { %p630_p12 = pnand %p628_p11, %p625_p10 }
  0x3a   :  { %633 = shalt.err (!%p630_p12)
}
  0x3b   :  { %s634_s21 = scalar_lea.vmem %s57_s12, 512  ;;  %p639_p0 = scmp.lt.s32.totalorder %s57_s12, %s57_s12 }
  0x3c   :  { %p635_p13 = scmp.ne.s32.totalorder %s57_s12, %s634_s21  ;;  %p640_p1 = scmp.lt.s32.totalorder %s634_s21, %s634_s21 }
  0x3e   :  { %p641_p2 = por %p640_p1, %p639_p0 }
  0x40   :  { %p642_p3 = pnand %p641_p2, %p635_p13 }
  0x42   :  { %645 = shalt.err (!%p642_p3)
}
  0x43   :  { %62 = dma.hbm_to_vmem [thread:$0]  %s834_s4, 512, %s57_s12, [#allocation9], %s677_s7, %s677_s7, %s678_s8  }
  0x44   :  { %668 = dma.done.wait [#allocation3], 32  }
  0x45   :  { %669 = vsyncadd [#allocation3], 4294967264 }
  0x46   :  { %670 = dma.done.wait [#allocation6], 768  }
  0x47   :  { %671 = vsyncadd [#allocation6], 4294966528 }
  0x48   :  { %672 = dma.done.wait [#allocation9], 512  }
  0x49   :  { %673 = vsyncadd [#allocation9], 4294966784  ;;  %v682_v0 = vmov 0.0|0.0   ;;  %vm683_vm0 = vmmov 0   ;;  %v684_v1 = vmov 0.0   ;;  %v88_v2 = vld [vmem:[#allocation7] sm:$0xff]  ;;  %v335_v48 = vlaneseq }
  0x4a   :  { %514 = vmatprep.subr.bf16.mxu0 %v682_v0  ;;  %488 = vmatprep.mubr.msk.f32.mxu0 %vm683_vm0, %v684_v1  ;;  %v89_v3 = vld [vmem:[#allocation7 + $0x8] sm:$0xff]  ;;  %v90_v4 = vld [vmem:[#allocation7 + $0x10] sm:$0xff]  ;;  %v91_v6 = vld [vmem:[#allocation7 + $0x18] sm:$0xff]  ;;  %vm82_vm1 = vcmask 1041408   ;;  %vm99_vm2 = vcmask 261120   ;;  %vm317_vm6 = vcmask 254976  }
  0x4b   :  { %520 = vmatprep.subr.bf16.mxu1 %v682_v0  ;;  %505 = vmatprep.mubr.msk.f32.mxu1 %vm683_vm0, %v684_v1  ;;  %v515_v5 = vpack.c.bf16 %v89_v3, %v88_v2  ;;  %v78_v7 = vld [vmem:[#allocation5] sm:$0xff]  ;;  %v518_v8 = vpack.c.bf16 %v91_v6, %v90_v4  ;;  %v77_v10 = vld [vmem:[#allocation2] sm:$0x3]  ;;  %v79_v11 = vld [vmem:[#allocation5 + $0x8] sm:$0xff]  ;;  %v685_v46 = vmov 1966171168  }
  0x4c   :  { %v83_v9 = vrot.slane %v78_v7, 6  ;;  %v84_v13 = vrot.slane %v79_v11, 6  ;;  %v205_v15 = vld [vmem:[#allocation8] sm:$0xff]  ;;  %v206_v16 = vld [vmem:[#allocation8 + $0x8] sm:$0xff]  ;;  %v207_v18 = vld [vmem:[#allocation8 + $0x10] sm:$0xff]  ;;  %v333_v47 = vunpack.c.l.s4 %v685_v46  ;;  %v802_v50 = vshrl.u32 %v335_v48, 7 }
  0x4d   :  { %516 = vmatpush3.bf16.msra.mxu0 %v515_v5  ;;  %v521_v17 = vpack.c.bf16 %v206_v16, %v205_v15  ;;  %v208_v19 = vld [vmem:[#allocation8 + $0x18] sm:$0xff]  ;;  %v455_v21 = vld [vmem:[%s833_s3] ss:$0 sm:$0xff]  ;;  %vm308_vm7 = vcmask 1045504   ;;  %vm411_vm8 = vcmask 1041409   ;;  %vm414_vm9 = vcmask 58368  }
  0x4e   :  { %517 = vmatprep.subr.bf16.mxu0 %v682_v0  ;;  %v87_v12 = vsel %vm82_vm1, %v77_v10, %v83_v9  ;;  %v85_v14 = vsel %vm82_vm1, %v83_v9, %v84_v13  ;;  %v524_v20 = vpack.c.bf16 %v208_v19, %v207_v18  ;;  %v334_v49 = vunpack.c.0.s8 %v333_v47  ;;  %v462_v51 = vld [vmem:[%s835_s5] ss:$0 sm:$0xff]  ;;  %s687_s5 = smov [#allocation10]  }
  0x4f   :  { %522 = vmatpush3.bf16.msra.mxu1 %v521_v17  ;;  %v356_v58 = vsub.s32 0, %v802_v50  ;;  %s444_s1 = sshll.u32 %s687_s5, 4  ;;  %vm436_vm10 = vcmask 8192   ;;  %s445_s1 = int_to_ptr.vmem [resolvable:$true] %s444_s1 }
  0x50   :  { %523 = vmatprep.subr.bf16.mxu1 %v682_v0  ;;  %v337_v52 = vsub.s32 %v334_v49, %v802_v50  ;;  %s646_s22 = scalar_lea.vmem %s445_s1, 16  ;;  %s650_s23 = scalar_lea.vmem %s445_s1, 32 }
  0x51   :  { %519 = vmatpush3.bf16.msra.mxu0 %v518_v8  ;;  %p647_p4 = scmp.ne.s32.totalorder %s445_s1, %s646_s22  ;;  %p651_p5 = scmp.lt.s32.totalorder %s445_s1, %s445_s1 }
  0x52   :  { %p652_p6 = scmp.lt.s32.totalorder %s650_s23, %s646_s22 }
  0x53   :  { %525 = vmatpush3.bf16.msra.mxu1 %v524_v20  ;;  %v686_v20 = vmov 0  }
  0x54   :  { %489 = vmatmul.mubr.msk.f32.vlgmr.msra.gmra.mrb[0].mxu0 %vm99_vm2, %v87_v12  ;;  %538 = vset.pattern.permute.xlu1 %v686_v20  ;;  %p653_p7 = por %p652_p6, %p651_p5 }
  0x55   :  { %491 = vmatprep.mubr.msk.f32.mxu0 %vm683_vm0, %v684_v1  ;;  %539 = vset.pattern.permute.xlu0 %v686_v20 }
  0x56   :  { %p654_p8 = pnand %p653_p7, %p647_p4 }
  0x58   :  { %492 = vmatmul.mubr.msk.f32.gmra.mrb[2].mxu0 %vm99_vm2, %v85_v14 }
  0x59   :  { %494 = vmatprep.mubr.msk.f32.mxu0 %vm683_vm0, %v684_v1 }
  0x5c   :  { %495 = vmatmul.mubr.msk.f32.gmra.mrb[4].mxu0 %vm99_vm2, %v84_v13 }
 0x127   :  { %v173_v22 = vpop.f32.mrb[0].mxu0 }
 0x128   :  { %v174_v23 = vadd.f32 %v455_v21, %v173_v22  ;;  %v490_v24 = vpop.f32.mrb[1].mxu0 }
 0x12a   :  { %v190_v25 = vmin.f32 %v174_v23, 0.0  ;;  %vm187_vm3 = vcmp.gt.f32.partialorder %v174_v23, 0.0 }
 0x12b   :  { %v178_v26 = vpop.f32.mrb[2].mxu0 }
 0x12c   :  { %v193_v27 = vmul.f32 1.442695, %v190_v25  ;;  %v179_v28 = vadd.f32 %v455_v21, %v178_v26  ;;  %v493_v29 = vpop.f32.mrb[3].mxu0  ;;  %v379_v25 = vsub.s32 1, %v802_v50 }
 0x12e   :  { %540 = vpow2.f32 %v193_v27  ;;  %v191_v30 = vmin.f32 %v179_v28, 0.0  ;;  %vm188_vm4 = vcmp.gt.f32.partialorder %v179_v28, 0.0 }
 0x12f   :  { %v183_v31 = vpop.f32.mrb[4].mxu0 }
 0x130   :  { %v195_v32 = vmul.f32 1.442695, %v191_v30  ;;  %v184_v33 = vadd.f32 %v455_v21, %v183_v31  ;;  %v496_v34 = vpop.f32.mrb[5].mxu0 }
 0x132   :  { %542 = vpow2.f32 %v195_v32  ;;  %v192_v35 = vmin.f32 %v184_v33, 0.0  ;;  %vm189_vm5 = vcmp.gt.f32.partialorder %v184_v33, 0.0 }
 0x134   :  { %v197_v36 = vmul.f32 1.442695, %v192_v35 }
 0x136   :  { %544 = vpow2.f32 %v197_v36 }
 0x138   :  { %v541_v37 = vpop.eup %540 }
 0x139   :  { %v459_v38 = vadd.f32 -1.0, %v541_v37 }
 0x13b   :  { %v202_v39 = vsel %vm187_vm3, %v174_v23, %v459_v38 }
 0x13c   :  { %v543_v40 = vpop.eup %542  ;;  %506 = vmatmul.mubr.msk.f32.vlgmr.msra.gmra.mrb[0].mxu1 %vm99_vm2, %v202_v39 }
 0x13d   :  { %508 = vmatprep.mubr.msk.f32.mxu1 %vm683_vm0, %v684_v1  ;;  %v460_v41 = vadd.f32 -1.0, %v543_v40 }
 0x13f   :  { %v203_v42 = vsel %vm188_vm4, %v179_v28, %v460_v41 }
 0x140   :  { %v545_v43 = vpop.eup %544  ;;  %509 = vmatmul.mubr.msk.f32.gmra.mrb[2].mxu1 %vm99_vm2, %v203_v42 }
 0x141   :  { %511 = vmatprep.mubr.msk.f32.mxu1 %vm683_vm0, %v684_v1  ;;  %v461_v44 = vadd.f32 -1.0, %v545_v43 }
 0x143   :  { %v204_v45 = vsel %vm189_vm5, %v184_v33, %v461_v44  ;;  %v402_v44 = vand.u32 127, %v335_v48 }
 0x144   :  { %512 = vmatmul.mubr.msk.f32.gmra.mrb[4].mxu1 %vm99_vm2, %v204_v45 }
 0x145   :  { %v405_v45 = vsub.s32 %v402_v44, %v802_v50 }
 0x20f   :  { %v291_v53 = vpop.f32.mrb[0].mxu1 }
 0x210   :  { %v292_v54 = vadd.f32 %v462_v51, %v291_v53  ;;  %v507_v55 = vpop.f32.mrb[1].mxu1 }
 0x212   :  { %v338_v56 = vrot.slane %v292_v54, %v337_v52  ;;  %v316_v57 = vmul.f32 %v292_v54, %v292_v54  ;;  %v309_v1 = vrot.slane %v292_v54, 2 }
 0x213   :  { %v296_v59 = vpop.f32.mrb[2].mxu1 }
 0x214   :  { %v339_v60 = vcombine.high %v338_v56, %v338_v56  ;;  %v297_v61 = vadd.f32 %v462_v51, %v296_v59  ;;  %v510_v62 = vpop.f32.mrb[3].mxu1  ;;  %v318_v63 = vsel %vm317_vm6, %v316_v57, 0.0  ;;  %v346_v0 = vrot.slane %v338_v56, %v337_v52 }
 0x215   :  { %319 = vadd.xlane.f32.xlu0 %v318_v63 }
 0x216   :  { %v310_v2 = vrot.slane %v297_v61, 2  ;;  %v357_v3 = vrot.slane %v346_v0, %v356_v58  ;;  %v353_v5 = vrot.slane %v339_v60, %v337_v52 }
 0x217   :  { %v301_v4 = vpop.f32.mrb[4].mxu1 }
 0x218   :  { %v302_v6 = vadd.f32 %v462_v51, %v301_v4  ;;  %v513_v7 = vpop.f32.mrb[5].mxu1  ;;  %v311_v8 = vsel %vm308_vm7, %v309_v1, %v310_v2  ;;  %v361_v13 = vrot.slane %v353_v5, %v356_v58 }
 0x219   :  { %v322_v9 = vmul.f32 %v311_v8, %v311_v8  ;;  %v364_v10 = vmul.f32 %v357_v3, %v311_v8 }
 0x21a   :  { %v312_v11 = vrot.slane %v302_v6, 2 }
 0x21b   :  { %v324_v12 = vsel %vm99_vm2, %v322_v9, 0.0  ;;  %v366_v19 = vsel %vm99_vm2, %v364_v10, 0.0 }
 0x21c   :  { %325 = vadd.xlane.f32.xlu0 %v324_v12  ;;  %v313_v14 = vsel %vm308_vm7, %v310_v2, %v312_v11 }
 0x21d   :  { %v365_v15 = vmul.f32 %v361_v13, %v313_v14  ;;  %v323_v16 = vmul.f32 %v313_v14, %v313_v14 }
 0x21f   :  { %v369_v17 = vsel %vm99_vm2, %v365_v15, 0.0  ;;  %v327_v18 = vsel %vm99_vm2, %v323_v16, 0.0 }
 0x220   :  { %370 = vadd.xlane.f32.xlu0 %v369_v17  ;;  %328 = vadd.xlane.f32.xlu1 %v327_v18 }
 0x224   :  { %367 = vadd.xlane.f32.xlu1 %v366_v19 }
 0x2a2   :  { %v320_v21 = vpop.xlane.xlu0 %319 }
 0x2a3   :  { %546 = vrsqrt.f32 %v320_v21 }
 0x2a9   :  { %v326_v22 = vpop.xlane.xlu0 %325 }
 0x2aa   :  { %548 = vrsqrt.f32 %v326_v22 }
 0x2ad   :  { %v547_v23 = vpop.eup %546  ;;  %v329_v24 = vpop.xlane.xlu1 %328 }
 0x2ae   :  { %550 = vrsqrt.f32 %v329_v24  ;;  %v376_v26 = vrot.slane %v547_v23, %v356_v58  ;;  %v380_v29 = vrot.slane %v547_v23, %v379_v25  ;;  %v371_v32 = vpop.xlane.xlu0 %370 }
 0x2b0   :  { %v384_v33 = vmul.f32 %v380_v29, %v371_v32 }
 0x2b1   :  { %v368_v27 = vpop.xlane.xlu1 %367 }
 0x2b2   :  { %v383_v28 = vmul.f32 %v376_v26, %v368_v27 }
 0x2b4   :  { %v549_v30 = vpop.eup %548 }
 0x2b5   :  { %v385_v31 = vmul.f32 %v549_v30, %v383_v28 }
 0x2b7   :  { %v387_v34 = vmul.f32 1.25, %v385_v31 }
 0x2b8   :  { %v551_v35 = vpop.eup %550 }
 0x2b9   :  { %v386_v36 = vmul.f32 %v551_v35, %v384_v33  ;;  %v389_v37 = vmul.f32 1.442695, %v387_v34 }
 0x2bb   :  { %v388_v38 = vmul.f32 1.25, %v386_v36  ;;  %552 = vpow2.f32 %v389_v37 }
 0x2bd   :  { %v391_v39 = vmul.f32 1.442695, %v388_v38  ;;  %v423_v40 = vrot.slane %v388_v38, 7 }
 0x2bf   :  { %554 = vpow2.f32 %v391_v39  ;;  %v424_v41 = vsel %vm411_vm8, %v423_v40, %v387_v34 }
 0x2c5   :  { %v553_v42 = vpop.eup %552 }
 0x2c6   :  { %396 = vperm.xlu1 %538, %v553_v42  }
 0x2c9   :  { %v555_v43 = vpop.eup %554 }
 0x2ca   :  { %399 = vperm.xlu0 %539, %v555_v43  }
 0x345   :  { %v397_v46 = vpop.permute.xlu1 %396 }
 0x346   :  { %v406_v49 = vrot.slane %v397_v46, %v405_v45 }
 0x349   :  { %v400_v47 = vpop.permute.xlu0 %399 }
 0x34a   :  { %v410_v51 = vrot.slane %v400_v47, %v405_v45 }
 0x34c   :  { %v412_v52 = vsel %vm411_vm8, %v410_v51, %v406_v49 }
 0x34d   :  { %v415_v53 = vsel %vm414_vm9, %v412_v52, 0.0 }
 0x34e   :  { %416 = vadd.xlane.f32.xlu1 %v415_v53 }
 0x3db   :  { %v417_v54 = vpop.xlane.xlu1 %416 }
 0x3dc   :  { %v418_v55 = vadd.f32 1e-08, %v417_v54 }
 0x3de   :  { %556 = vlog2.f32 %v418_v55 }
 0x3e8   :  { %v557_v56 = vpop.eup %556 }
 0x3e9   :  { %v420_v57 = vmul.f32 0.6931472, %v557_v56 }
 0x3eb   :  { %v426_v58 = vsub.f32 %v420_v57, %v424_v41 }
 0x3ed   :  { %429 = vperm.xlu0 %539, %v426_v58  }
 0x46c   :  { %v430_v48 = vpop.permute.xlu0 %429 }
 0x46d   :  { %v434_v50 = vrot.slane %v430_v48, %v405_v45 }
 0x46f   :  { %437 = vst.msk [vmem:[#allocation10] sm:$0x1] %vm436_vm10, %v434_v50 }
 0x470   :  { %657 = shalt.err (!%p654_p8)
}
 0x471   :  { %s658_s26 = scalar_lea.hbm %s836_s6, 16 }
 0x472   :  { %p659_p9 = scmp.ne.s32.totalorder %s836_s6, %s658_s26  ;;  %p662_p10 = scmp.lt.u32.totalorder %s658_s26, %s836_s6 }
 0x474   :  { %p664_p11 = pnand %p662_p10, %p659_p9 }
 0x476   :  { %667 = shalt.err (!%p664_p11)
}
 0x477   :  { %447 = dma.vmem_to_hbm [thread:$0]  %s445_s1, 16, %s836_s6, [#allocation4]  }
 0x478   :  { %674 = dma.done.wait [#allocation4], 16  }
 0x479   :  { %675 = vsyncadd [#allocation4], 4294967280 }
 0x47a   :  { %451 = vsyncpa [#allocation3], 1 }
 0x47b   :  { %452 = vsyncpa [#allocation6], 1 }
 0x47c   :  { %453 = vsyncpa [#allocation9], 1 }
 0x47d   :  { %454 = vsyncpa [#allocation4], 1 }

</bundles_post_ra>
